<compile_context>
chip_gen: v7x
topology: tpu7x:2x2x1
jax: 0.10.0
libtpu: 0.0.40
codegen_flags: <defaults>
</compile_context>

<pallas_src>
import functools

import jax
import jax.numpy as jnp
from jax.experimental import pallas as pl
from jax.experimental.pallas import tpu as pltpu


def _round_up(x, m):
    return ((x + m - 1) // m) * m


def _physical_vmem_bytes():
    try:
        return int(pltpu.get_tpu_info().vmem_capacity_bytes)
    except Exception:
        return 64 * 1024 * 1024  # assume the tightest budget (v7x) if unknown


def _wce_kernel(logits_ref, tgt_ref, wrow_ref, out_ref, *,
                n_valid, tile_n, n_classes, need_mask):
    i = pl.program_id(0)

    logits = logits_ref[...].astype(jnp.float32)            # (TN, C) f32 math
    tgt = tgt_ref[...]                                       # (TN, 1) int32
    w_row = wrow_ref[...]                                    # (TN, 1) f32

    # numerically-stable log-sum-exp per row
    m = jnp.max(logits, axis=-1, keepdims=True)              # (TN, 1)
    lse = jnp.log(jnp.sum(jnp.exp(logits - m), axis=-1, keepdims=True)) + m

    # gather target logit via a (1, C) iota broadcast (no (TN,C) int32 temp)
    col = jax.lax.broadcasted_iota(jnp.int32, (1, n_classes), 1)   # (1, C)
    hit = col == tgt                                               # (TN, C) bool
    tgt_logit = jnp.sum(jnp.where(hit, logits, 0.0), axis=-1, keepdims=True)

    nll = lse - tgt_logit                                    # (TN, 1)

    if need_mask:
        # rows past the true batch size come from the un-DMA'd region of the
        # last block (undefined contents) -> zero their contribution to BOTH
        # numerator and denominator (never rely on 0 * garbage).
        row = i * tile_n + jax.lax.broadcasted_iota(jnp.int32, (tile_n, 1), 0)
        valid = row < n_valid
        contrib = jnp.where(valid, w_row * nll, 0.0)
        w_row = jnp.where(valid, w_row, 0.0)
    else:
        contrib = w_row * nll

    num = jnp.sum(contrib, axis=0, keepdims=True)            # (1, 1) partial num
    den = jnp.sum(w_row, axis=0, keepdims=True)              # (1, 1) partial den

    # lane 0 <- numerator, lane 1 <- denominator, rest zero (lane-dense store)
    lane = jax.lax.broadcasted_iota(jnp.int32, (1, 1, 128), 2)
    out_ref[...] = jnp.where(lane == 0, num[None],
                             jnp.where(lane == 1, den[None], 0.0))


def weighted_cross_entropy(logits, targets, weight=None, *, tile_n=None):
    """Weighted mean cross-entropy, matching F.cross_entropy(..., weight=w)."""
    N, C = logits.shape
    if weight is None:
        weight = jnp.ones((C,), dtype=jnp.float32)

    itemsize = jnp.dtype(logits.dtype).itemsize
    # sublane alignment of the input's packed tile: 8 f32 / 16 bf16 / 32 int8
    align = max(8, 32 // max(1, itemsize))

    phys_vmem = _physical_vmem_bytes()
    if phys_vmem >= 128 * 1024 * 1024:           # v5e / v6e: roomy VMEM
        target_block_bytes = 12 * 1024 * 1024
        vmem_cap = 96 * 1024 * 1024
    else:                                        # v7x (64 MiB) or unknown
        target_block_bytes = 4 * 1024 * 1024
        vmem_cap = 48 * 1024 * 1024

    if tile_n is None:
        # budget by the f32 WORKING set (intermediates are f32 even for bf16 in)
        tile_n = max(align, (target_block_bytes // (C * 4)) // align * align)
        # keep >= ~4 grid steps when N allows: v7x's two TCs both get work and
        # double buffering has something to overlap with.
        tile_n = min(tile_n, _round_up(pl.cdiv(N, 4), align))
    else:
        tile_n = max(align, (tile_n // align) * align)

    grid = pl.cdiv(N, tile_n)
    need_mask = grid * tile_n != N               # ragged last tile -> in-kernel mask

    tgt2d = targets.astype(jnp.int32).reshape(N, 1)
    # class-weight gather hoisted out of the kernel: tiny XLA gather, streamed
    # alongside the logits as a (tile_n, 1) block.
    wrow2d = weight.astype(jnp.float32)[targets].reshape(N, 1)

    input_block_bytes = tile_n * C * itemsize + 2 * tile_n * 4
    f32_block_bytes = tile_n * C * 4
    # 2x double-buffered inputs + ~4 f32 blocks of headroom for Mosaic
    # elementwise temporaries (upcast logits, exp, where results) + slack.
    want = 2 * input_block_bytes + 4 * f32_block_bytes + (1 << 20)
    vmem_limit = int(min(vmem_cap, max(32 * 1024 * 1024, want)))

    kernel = functools.partial(
        _wce_kernel, n_valid=N, tile_n=tile_n, n_classes=C, need_mask=need_mask)

    partials = pl.pallas_call(
        kernel,
        out_shape=jax.ShapeDtypeStruct((grid, 1, 128), jnp.float32),
        grid_spec=pltpu.PrefetchScalarGridSpec(
            num_scalar_prefetch=0,
            grid=(grid,),
            in_specs=[
                pl.BlockSpec((tile_n, C), lambda i: (i, 0)),   # logits tile
                pl.BlockSpec((tile_n, 1), lambda i: (i, 0)),   # targets tile
                pl.BlockSpec((tile_n, 1), lambda i: (i, 0)),   # w[target] tile
            ],
            out_specs=pl.BlockSpec((1, 1, 128), lambda i: (i, 0, 0)),
        ),
        compiler_params=pltpu.CompilerParams(
            dimension_semantics=("parallel",),   # blocks are independent
            vmem_limit_bytes=vmem_limit,
        ),
    )(logits, tgt2d, wrow2d)

    num = jnp.sum(partials[:, 0, 0])
    den = jnp.sum(partials[:, 0, 1])
    return num / den   # NaN when sum of selected weights is 0 (matches PyTorch)


def _reference(logits, targets, weight):
    logits = logits.astype(jnp.float32)
    logp = jax.nn.log_softmax(logits, axis=-1)
    nll = -jnp.take_along_axis(logp, targets[:, None].astype(jnp.int32), axis=-1)[:, 0]
    w_row = weight[targets]
    return jnp.sum(w_row * nll) / jnp.sum(w_row)


if __name__ == "__main__":
    key = jax.random.PRNGKey(0)
    k1, k2, k3, k4, k5, k6, k7 = jax.random.split(key, 7)

    # small shapes consistent with the module: batch=16 samples, 32 classes
    N, C = 16, 32
    logits = jax.random.normal(k1, (N, C), dtype=jnp.float32)
    targets = jax.random.randint(k2, (N,), 0, C, dtype=jnp.int32)
    # deterministic synthetic class weights (the module's `weight` parameter)
    weight = jax.random.uniform(k3, (C,), dtype=jnp.float32, minval=0.5, maxval=2.0)

    loss = jax.block_until_ready(weighted_cross_entropy(logits, targets, weight))
    ref = _reference(logits, targets, weight)
    assert jnp.allclose(loss, ref, atol=1e-5, rtol=1e-5), (loss, ref)

    # ragged batch (N not a multiple of the tile) exercises the in-kernel mask
    N2 = 50
    logits2 = jax.random.normal(k4, (N2, C), dtype=jnp.float32)
    targets2 = jax.random.randint(k5, (N2,), 0, C, dtype=jnp.int32)
    loss2 = jax.block_until_ready(
        weighted_cross_entropy(logits2, targets2, weight, tile_n=16))
    ref2 = _reference(logits2, targets2, weight)
    assert jnp.allclose(loss2, ref2, atol=1e-5, rtol=1e-5), (loss2, ref2)

    # bf16 logits (halved HBM stream) + ragged batch + auto tile sizing
    N3 = 40
    logits3 = jax.random.normal(k6, (N3, C), dtype=jnp.float32).astype(jnp.bfloat16)
    targets3 = jax.random.randint(k7, (N3,), 0, C, dtype=jnp.int32)
    loss3 = jax.block_until_ready(
        weighted_cross_entropy(logits3, targets3, weight))
    ref3 = _reference(logits3.astype(jnp.float32), targets3, weight)
    assert jnp.allclose(loss3, ref3, atol=1e-4, rtol=1e-4), (loss3, ref3)

    print("KERNEL_OK")
</pallas_src>

<mosaic_0001>
module attributes {stable_mosaic.version = 11 : i64} {
  func.func @_wce_kernel(%arg0: i32, %arg1: memref<8x32xf32, #tpu.memory_space<vmem>>, %arg2: memref<8x1xi32, #tpu.memory_space<vmem>>, %arg3: memref<8x1xf32, #tpu.memory_space<vmem>>, %arg4: memref<1x1x128xf32, #tpu.memory_space<vmem>>) attributes {dimension_semantics = [#tpu.dimension_semantics<parallel>], iteration_bounds = array<i64: 2>, scalar_prefetch = 0 : i64, scratch_operands = 0 : i64, tpu.core_type = #tpu.core_type<tc>, window_params = [{transform_indices = @transform_0, window_bounds = array<i64: 8, 32>}, {transform_indices = @transform_1, window_bounds = array<i64: 8, 1>}, {transform_indices = @transform_2, window_bounds = array<i64: 8, 1>}, {transform_indices = @transform_3, window_bounds = array<i64: 1, 1, 128>}]} {
    %c0 = arith.constant 0 : index
    %c0_0 = arith.constant 0 : index
    %0 = vector.load %arg1[%c0, %c0_0] : memref<8x32xf32, #tpu.memory_space<vmem>>, vector<8x32xf32>
    %c0_1 = arith.constant 0 : index
    %c0_2 = arith.constant 0 : index
    %1 = vector.load %arg2[%c0_1, %c0_2] : memref<8x1xi32, #tpu.memory_space<vmem>>, vector<8x1xi32>
    %c0_3 = arith.constant 0 : index
    %c0_4 = arith.constant 0 : index
    %2 = vector.load %arg3[%c0_3, %c0_4] : memref<8x1xf32, #tpu.memory_space<vmem>>, vector<8x1xf32>
    %cst = arith.constant dense<0xFF800000> : vector<8xf32>
    %3 = vector.multi_reduction <maximumf>, %0, %cst [1] : vector<8x32xf32> to vector<8xf32>
    %4 = vector.shape_cast %3 : vector<8xf32> to vector<8x1xf32>
    %5 = vector.broadcast %4 : vector<8x1xf32> to vector<8x32xf32>
    %6 = arith.subf %0, %5 : vector<8x32xf32>
    %7 = math.exp %6 : vector<8x32xf32>
    %cst_5 = arith.constant dense<0.000000e+00> : vector<8xf32>
    %8 = vector.multi_reduction <add>, %7, %cst_5 [1] : vector<8x32xf32> to vector<8xf32>
    %9 = vector.shape_cast %8 : vector<8xf32> to vector<8x1xf32>
    %10 = math.log %9 : vector<8x1xf32>
    %11 = arith.addf %10, %4 : vector<8x1xf32>
    %12 = tpu.iota {dimensions = array<i32: 1>} : vector<1x32xi32>
    %13 = vector.broadcast %12 : vector<1x32xi32> to vector<8x32xi32>
    %14 = vector.broadcast %1 : vector<8x1xi32> to vector<8x32xi32>
    %15 = arith.cmpi eq, %13, %14 : vector<8x32xi32>
    %cst_6 = arith.constant 0.000000e+00 : f32
    %16 = vector.broadcast %cst_6 : f32 to vector<8x32xf32>
    %17 = arith.select %15, %0, %16 : vector<8x32xi1>, vector<8x32xf32>
    %cst_7 = arith.constant dense<0.000000e+00> : vector<8xf32>
    %18 = vector.multi_reduction <add>, %17, %cst_7 [1] : vector<8x32xf32> to vector<8xf32>
    %19 = vector.shape_cast %18 : vector<8xf32> to vector<8x1xf32>
    %20 = arith.subf %11, %19 : vector<8x1xf32>
    %21 = arith.mulf %2, %20 : vector<8x1xf32>
    %cst_8 = arith.constant dense<0.000000e+00> : vector<1xf32>
    %22 = vector.multi_reduction <add>, %21, %cst_8 [0] : vector<8x1xf32> to vector<1xf32>
    %23 = vector.shape_cast %22 : vector<1xf32> to vector<1x1xf32>
    %cst_9 = arith.constant dense<0.000000e+00> : vector<1xf32>
    %24 = vector.multi_reduction <add>, %2, %cst_9 [0] : vector<8x1xf32> to vector<1xf32>
    %25 = vector.shape_cast %24 : vector<1xf32> to vector<1x1xf32>
    %26 = tpu.iota {dimensions = array<i32: 2>} : vector<1x1x128xi32>
    %c0_i32 = arith.constant 0 : i32
    %27 = vector.broadcast %c0_i32 : i32 to vector<1x1x128xi32>
    %28 = arith.cmpi eq, %26, %27 : vector<1x1x128xi32>
    %29 = vector.shape_cast %23 : vector<1x1xf32> to vector<1x1x1xf32>
    %c1_i32 = arith.constant 1 : i32
    %30 = vector.broadcast %c1_i32 : i32 to vector<1x1x128xi32>
    %31 = arith.cmpi eq, %26, %30 : vector<1x1x128xi32>
    %32 = vector.shape_cast %25 : vector<1x1xf32> to vector<1x1x1xf32>
    %cst_10 = arith.constant 0.000000e+00 : f32
    %33 = vector.shape_cast %32 : vector<1x1x1xf32> to vector<1x1x1xf32>
    %34 = vector.broadcast %33 : vector<1x1x1xf32> to vector<1x1x128xf32>
    %35 = vector.broadcast %cst_10 : f32 to vector<1x1x128xf32>
    %36 = arith.select %31, %34, %35 : vector<1x1x128xi1>, vector<1x1x128xf32>
    %37 = vector.shape_cast %29 : vector<1x1x1xf32> to vector<1x1x1xf32>
    %38 = vector.broadcast %37 : vector<1x1x1xf32> to vector<1x1x128xf32>
    %39 = arith.select %28, %38, %36 : vector<1x1x128xi1>, vector<1x1x128xf32>
    %c0_11 = arith.constant 0 : index
    %c0_12 = arith.constant 0 : index
    %c0_13 = arith.constant 0 : index
    %40 = vector.load %arg4[%c0_11, %c0_12, %c0_13] : memref<1x1x128xf32, #tpu.memory_space<vmem>>, vector<1x1x128xf32>
    tpu.vector_store %arg4[%c0_11, %c0_12, %c0_13], %39 {strides = array<i32>} : memref<1x1x128xf32, #tpu.memory_space<vmem>>, vector<1x1x128xf32>,
    return
  }
  func.func @transform_0(%arg0: i32) -> (i32, i32) {
    %c0_i32 = arith.constant 0 : i32
    %c0_i32_0 = arith.constant 0 : i32
    return %arg0, %c0_i32 : i32, i32
  }
  func.func @transform_1(%arg0: i32) -> (i32, i32) {
    %c0_i32 = arith.constant 0 : i32
    %c0_i32_0 = arith.constant 0 : i32
    return %arg0, %c0_i32 : i32, i32
  }
  func.func @transform_2(%arg0: i32) -> (i32, i32) {
    %c0_i32 = arith.constant 0 : i32
    %c0_i32_0 = arith.constant 0 : i32
    return %arg0, %c0_i32 : i32, i32
  }
  func.func @transform_3(%arg0: i32) -> (i32, i32, i32) {
    %c0_i32 = arith.constant 0 : i32
    %c0_i32_0 = arith.constant 0 : i32
    %c0_i32_1 = arith.constant 0 : i32
    return %arg0, %c0_i32, %c0_i32_0 : i32, i32, i32
  }
}

</mosaic_0001>

<bundles_post_ra>
// kernel: tpu_custom_call.1
= control target key start
LH: loop header
LB: loop body
LE: loop exit
PB: predicated region body
PF: predicated region fallthrough
CT: control target
= control target key end

     0   :  { %8 = vsyncpa [#allocation3], 0  ;;  %s602_s0 = inlined_call_operand.vmem [shape: f32[16,32], index: 0, kind: input, shape index: {}]   ;;  %s603_s1 = inlined_call_operand.vmem [shape: s32[16,1], index: 1, kind: input, shape index: {}]   ;;  %s604_s2 = inlined_call_operand.vmem [shape: f32[16,1], index: 2, kind: input, shape index: {}]   ;;  %s605_s3 = inlined_call_operand.hbm [shape: f32[2,1,128], index: 3, kind: output, shape index: {}]  }
   0x1   :  { %10 = vsyncpa [#allocation3 + $0x1], 0  ;;  %s491_s12 = smov 0   ;;  %s493_s13 = smov 0  }
   0x2   :  { %s495_s14 = smov 0   ;;  %s497_s15 = smov 0  }
   0x3 LB: > { %s512_s16 = sadd.s32 4294967295, %s467_s15   ;;  %s349_s17 = sadd.s32 4294967294, %s467_s15   ;;  %s467_s15 = sphi %s497_s15, %s611_s15   ;;  %s463_s14 = sphi %s495_s14, %s610_s14   ;;  %s459_s13 = sphi %s493_s13, %s609_s13   ;;  %s455_s12 = sphi %s491_s12, %s608_s12  }
   0x4   : > { %s516_s18 = sadd.s32 1, %s467_s15   ;;  %s101_s19 = sadd.s32 1, %s463_s14 }
   0x5   : > { %s98_s20 = ssub.s32 %s467_s15, %s516_s18  ;;  %p111_p0 = scmp.ne.s32.totalorder %s463_s14, %s459_s13 }
   0x6   : > { %p99_p1 = scmp.eq.s32.totalorder %s98_s20, 0  ;;  %p112_p2 = scmp.eq.s32.totalorder %s512_s16, 1 }
   0x7   : > { %p117_p3 = scmp.ne.s32.totalorder %s459_s13, %s455_s12  ;;  %p118_p4 = scmp.eq.s32.totalorder %s349_s17, 1 }
   0x8   : > { %s527_s21 = scalar_select %p99_p1, %s463_s14, %s101_s19  }
   0x9   : > { %p529_p5 = por %p112_p2, %p111_p0  ;;  %p533_p6 = por %p118_p4, %p117_p3 }
   0xa   : > { %p352_p7 = scmp.ge.s32.totalorder %s467_s15, 1  ;;  %p157_p8 = scmp.lt.s32.totalorder %s467_s15, 3 }
   0xc   : > { %p158_p9 = pnand %p352_p7, %p157_p8 }
   0xd   : > { %p187_p10 = scmp.lt.s32.totalorder (!%p158_p9), %s512_s16, 1  ;;  %v469_v0 = vmov (!%p158_p9), 0   ;;  %vm202_vm0 = vcmask (!%p158_p9), 261120   ;;  %v215_v7 = vlaneseq (!%p158_p9)  ;;  %vm227_vm2 = vcmask (!%p158_p9), 7168   ;;  %s185_s8 = sand.u32 (!%p158_p9), 1, %s459_s13  }
   0xe   : > { %161 = sbr.rel (%p158_p9) target bundleno = 502 (0x1f6), region = 32  ;;  %399 = vset.pattern.permute.xlu0 (!%p158_p9), %v469_v0  ;;  %400 = vset.pattern.permute.xlu1 (!%p158_p9), %v469_v0  ;;  %s356_s9 = sshll.u32 (!%p158_p9), %s512_s16, 4 }
   0xf   : > { %v216_v8 = vand.u32 (!%p158_p9), 127, %v215_v7  ;;  %s186_s10 = scalar_lea.vmem (!%p158_p9), [#allocation2], %s185_s8  ;;  %s560_s20 = scalar_lea.hbm (!%p158_p9), %s605_s3, %s356_s9 }
  0x10   : > { %s270_s11 = sshll.u32 (!%p158_p9), %s186_s10, 4  ;;  %s562_s11 = int_to_ptr.vmem [resolvable:$true] %s270_s11 }
  0x11   : > { %vm243_vm3 = vcmp.eq.s32.totalorder (!%p158_p9), %v216_v8, 1  ;;  %vm242_vm4 = vcmp.eq.s32.totalorder (!%p158_p9), %v216_v8, 0 }
  0x15   : > { %s188_s24 = scalar_select %p187_p10, %s512_s16, 1 }
  0x16   : > { %s470_s16 = smov [#allocation2]  }
  0x17   : > { %s353_s25 = sshll.u32 %s188_s24, 3  ;;  %s258_s24 = scalar_lea.sflag [#allocation3], %s185_s8 }
  0x18   : > { %s190_s28 = scalar_lea.vmem %s602_s0, %s353_s25  ;;  %s194_s4 = scalar_lea.vmem %s603_s1, %s353_s25 }
  0x19   : > { %v199_v1 = vld [vmem:[%s190_s28] sm:$0xff]  ;;  %s198_s7 = scalar_lea.vmem %s604_s2, %s353_s25  ;;  %s405_s25 = scalar_lea.vmem %s562_s11, 16 }
  0x1a   : > { %v203_v2 = vsel %vm202_vm0, %v199_v1, -inf  ;;  %v200_v3 = vld [vmem:[%s194_s4] sm:$0xff]  ;;  %p406_p11 = scmp.ne.s32.totalorder %s562_s11, %s405_s25  ;;  %s409_s26 = sshll.u32 %s470_s16, 4  ;;  %s410_s26 = int_to_ptr.vmem [resolvable:$false] %s409_s26 }
  0x1b   : > { %204 = vmax.xlane.f32.xlu0 %v203_v2  ;;  %v201_v14 = vld [vmem:[%s198_s7] sm:$0xff]  ;;  %s411_s27 = scalar_lea.vmem %s410_s26, 32  ;;  %p412_p0 = scmp.lt.s32.totalorder %s562_s11, %s410_s26 }
  0x1c   : > { %v235_v15 = vsel %vm227_vm2, %v201_v14, 0.0  ;;  %p407_p12 = pnand %p406_p11, %p529_p5  ;;  %p413_p1 = scmp.lt.s32.totalorder %s411_s27, %s405_s25 }
  0x1d   : > { %v236_v16 = vrot.slane %v235_v15, 4 }
  0x1e   : > { %p408_p13 = pneg %p407_p12  ;;  %p414_p2 = por %p413_p1, %p412_p0 }
  0x1f   : > { %v237_v17 = vadd.f32 %v236_v16, %v235_v15 }
  0x20   : > { %p415_p3 = pnand %p414_p2, %p408_p13 }
  0x21   : > { %v238_v18 = vrot.slane %v237_v17, 2 }
  0x23   : > { %v239_v19 = vadd.f32 %v238_v18, %v237_v17 }
  0x25   : > { %v240_v20 = vrot.slane %v239_v19, 1 }
  0x27   : > { %v241_v21 = vadd.f32 %v240_v20, %v239_v19 }
  0x31   : > { %218 = vperm.xlu0 %399, %v200_v3  }
  0xa8   : > { %v205_v4 = vpop.xlane.xlu0 %204 }
  0xa9   : > { %v206_v5 = vsub.f32 %v199_v1, %v205_v4 }
  0xab   : > { %v207_v6 = vmul.f32 1.442695, %v206_v5 }
  0xad   : > { %401 = vpow2.f32 %v207_v6 }
  0xb0   : > { %v219_v9 = vpop.permute.xlu0 %218 }
  0xb1   : > { %vm220_vm1 = vcmp.eq.s32.totalorder %v216_v8, %v219_v9 }
  0xb2   : > { %v221_v11 = vsel %vm220_vm1, %v199_v1, 0.0 }
  0xb3   : > { %v222_v13 = vsel %vm202_vm0, %v221_v11, 0.0 }
  0xb7   : > { %v402_v10 = vpop.eup %401 }
  0xb8   : > { %v209_v12 = vsel %vm202_vm0, %v402_v10, 0.0 }
  0xb9   : > { %210 = vadd.xlane.f32.xlu1 %v209_v12 }
  0xbd   : > { %223 = vadd.xlane.f32.xlu1 %v222_v13 }
  0xce   : > { %246 = vperm.xlu1 %400, %v241_v21  }
 0x146   : > { %v211_v22 = vpop.xlane.xlu1 %210 }
 0x147   : > { %403 = vlog2.f32 %v211_v22 }
 0x14a   : > { %v224_v25 = vpop.xlane.xlu1 %223 }
 0x14e   : > { %v247_v36 = vpop.permute.xlu1 %246 }
 0x14f   : > { %v249_v37 = vsel %vm243_vm3, %v247_v36, 0.0 }
 0x151   : > { %v404_v23 = vpop.eup %403 }
 0x152   : > { %v213_v24 = vmul.f32 0.6931472, %v404_v23 }
 0x154   : > { %v214_v26 = vadd.f32 %v213_v24, %v205_v4 }
 0x156   : > { %v225_v27 = vsub.f32 %v214_v26, %v224_v25 }
 0x158   : > { %v226_v28 = vmul.f32 %v225_v27, %v201_v14 }
 0x15a   : > { %v228_v29 = vsel %vm227_vm2, %v226_v28, 0.0 }
 0x15b   : > { %v229_v30 = vrot.slane %v228_v29, 4 }
 0x15d   : > { %v230_v31 = vadd.f32 %v229_v30, %v228_v29 }
 0x15f   : > { %v231_v32 = vrot.slane %v230_v31, 2 }
 0x161   : > { %v232_v33 = vadd.f32 %v231_v32, %v230_v31 }
 0x163   : > { %v233_v34 = vrot.slane %v232_v33, 1 }
 0x165   : > { %v234_v35 = vadd.f32 %v233_v34, %v232_v33 }
 0x167   : > { %252 = vperm.xlu1 %400, %v234_v35  }
 0x1e6   : > { %v253_v38 = vpop.permute.xlu1 %252 }
 0x1e7   : > { %v255_v39 = vsel %vm242_vm4, %v253_v38, %v249_v37 }
 0x1e8   : > { %256 = vst [vmem:[%s186_s10] sm:$0x1] %v255_v39 }
 0x1e9   : > { %418 = shalt.err (!%p415_p3)
}
 0x1ea   : > { %s419_s28 = scalar_lea.hbm %s560_s20, 16  ;;  %s423_s4 = scalar_lea.hbm %s605_s3, 32 }
 0x1eb   : > { %p420_p4 = scmp.ne.s32.totalorder %s560_s20, %s419_s28  ;;  %p424_p9 = scmp.lt.u32.totalorder %s560_s20, %s605_s3 }
 0x1ec   : > { %p425_p10 = scmp.lt.u32.totalorder %s423_s4, %s419_s28  ;;  %p427_p12 = scmp.lt.u32.totalorder %s419_s28, %s560_s20 }
 0x1ed   : > { %p421_p7 = pnand %p420_p4, %p529_p5 }
 0x1ee   : > { %p426_p11 = por %p425_p10, %p424_p9 }
 0x1ef   : > { %p422_p8 = pneg %p421_p7 }
 0x1f0   : > { %p428_p13 = por %p427_p12, %p426_p11 }
 0x1f2   : > { %p429_p0 = pnand %p428_p13, %p422_p8 }
 0x1f4   : > { %432 = shalt.err (!%p429_p0)
}
 0x1f5   : > { %359 = dma.vmem_to_hbm [thread:$0]  (%p529_p5), %s562_s11, 16, %s560_s20, %s258_s24  }
 0x1f6 PF: > { %p365_p1 = scmp.ge.s32.totalorder %s467_s15, 2  ;;  %s282_s7 = sand.u32 1, %s455_s12  }
 0x1f7   : > { %s283_s8 = scalar_lea.sflag [#allocation3], %s282_s7 }
 0x1f8   : > { %p362_p2 = pnand %p365_p1, %p533_p6 }
 0x1fa   : > { %450 = dma.done.wait (!%p362_p2), %s283_s8, 16  }
 0x1fb   : > { %452 = vsyncadd (!%p362_p2), %s283_s8, 4294967280  ;;  %p13_p3 = scmp.ge.s32.totalorder %s516_s18, 4   ;;  %s608_s12 = smov %s459_s13 }
 0x1fc   : > { %s609_s13 = smov %s463_s14  ;;  %s610_s14 = smov %s527_s21 }
 0x1fd   : > { %s611_s15 = smov %s516_s18  ;;  %15 = sbr.rel (!%p13_p3) target bundleno = 3 (0x3), region = 73 }
 0x204   :  { %287 = vsyncpa [#allocation3], 1 }
 0x205   :  { %289 = vsyncpa [#allocation3 + $0x1], 1 }

</bundles_post_ra>
